<compile_context>
chip_gen: v6e
topology: v6e:2x2x1
jax: 0.10.0
libtpu: 0.0.40
codegen_flags: <defaults>
</compile_context>

<pallas_src>
import functools

import jax
import jax.numpy as jnp
from jax.experimental import pallas as pl
from jax.experimental.pallas import tpu as pltpu


def _cross_attention_kernel(xq_ref, xkv_ref, wq_t_ref, wkv_t_ref, wproj_t_ref,
                            bproj_ref, out_ref, *, num_heads, head_dim,
                            block_b, mxu_dtype, approx_recip):
    bb, nq, c = xq_ref.shape
    nkv = xkv_ref.shape[1]

    # Flatten the batch tile so projection matmuls get M = block_b * N rows.
    xq = xq_ref[...].reshape(bb * nq, c).astype(mxu_dtype)
    xkv = xkv_ref[...].reshape(bb * nkv, c).astype(mxu_dtype)

    # Projections. Weights are already transposed (in_features first) and the
    # softmax scale is folded into Wq, so these are plain dots with f32
    # accumulation on the MXU and no in-kernel transpose.
    q = jnp.dot(xq, wq_t_ref[...], preferred_element_type=jnp.float32)    # (bb*nq, C), pre-scaled
    kv = jnp.dot(xkv, wkv_t_ref[...], preferred_element_type=jnp.float32)  # (bb*nkv, 2C)
    k = kv[:, :c]                                                          # (bb*nkv, C)
    v = kv[:, c:]                                                          # (bb*nkv, C)

    ctx_rows = []
    for bi in range(block_b):
        qb = q[bi * nq:(bi + 1) * nq]          # (nq, C)  f32
        kb = k[bi * nkv:(bi + 1) * nkv]        # (nkv, C) f32
        vb = v[bi * nkv:(bi + 1) * nkv]        # (nkv, C) f32
        head_out = []
        for h in range(num_heads):
            sl = slice(h * head_dim, (h + 1) * head_dim)
            # TODO(synk): for head_dim < 128, pad head_dim up to a full lane
            # width for fully lane-aligned per-head slices.
            qh = qb[:, sl].astype(mxu_dtype)   # (nq, hd)
            kh = kb[:, sl].astype(mxu_dtype)   # (nkv, hd)
            vh = vb[:, sl].astype(mxu_dtype)   # (nkv, hd)

            # q @ k^T via contraction on the last dim of both (no transpose op).
            s = jax.lax.dot_general(
                qh, kh,
                dimension_numbers=(((1,), (1,)), ((), ())),
                preferred_element_type=jnp.float32)            # (nq, nkv)

            # Numerically stable softmax over keys, in f32.
            m = jnp.max(s, axis=-1, keepdims=True)
            p = jnp.exp(s - m)
            denom = jnp.sum(p, axis=-1, keepdims=True)
            p = p * pl.reciprocal(denom, approx=approx_recip)

            head_out.append(
                jnp.dot(p.astype(mxu_dtype), vh,
                        preferred_element_type=jnp.float32))   # (nq, hd)
        ctx_rows.append(jnp.concatenate(head_out, axis=-1))    # (nq, C)

    ctx = jnp.concatenate(ctx_rows, axis=0)                    # (bb*nq, C)

    # Output projection (nn.Linear with bias), bias added in f32.
    y = jnp.dot(ctx.astype(mxu_dtype), wproj_t_ref[...],
                preferred_element_type=jnp.float32) + bproj_ref[...]

    out_ref[...] = y.reshape(bb, nq, c).astype(out_ref.dtype)


def _pick_block_b(B, Nq, target_rows=256):
    """Largest divisor of B with block_b*Nq <= target_rows, keeping >=2 grid
    steps (megacore/v7x) when B >= 2."""
    best = 1
    for bb in range(1, B + 1):
        if B % bb != 0:
            continue
        if bb * Nq > target_rows:
            continue
        if B >= 2 and (B // bb) < 2:
            continue
        best = bb
    return best


def cross_attention_pallas(x_q, x_kv, params, *, num_heads,
                           mxu_dtype=jnp.bfloat16, approx_recip=True,
                           block_b=None):
    B, Nq, C = x_q.shape
    _, Nkv, _ = x_kv.shape
    assert C % num_heads == 0
    head_dim = C // num_heads
    scale = head_dim ** (-0.5)

    if block_b is None:
        block_b = _pick_block_b(B, Nq)
    assert B % block_b == 0
    grid_b = B // block_b

    # One-time wrapper-side layout fixups:
    #   * transpose weights to (in_features, out_features)
    #   * fold the softmax scale into Wq
    #   * pre-cast weights to the MXU operand dtype
    wq_t = (params['wq'] * scale).T.astype(mxu_dtype)      # (C, C)
    wkv_t = params['wkv'].T.astype(mxu_dtype)              # (C, 2C)
    wproj_t = params['wproj'].T.astype(mxu_dtype)          # (C, C)
    bproj = params['bproj'].reshape(1, C).astype(jnp.float32)

    kernel = functools.partial(_cross_attention_kernel,
                               num_heads=num_heads,
                               head_dim=head_dim,
                               block_b=block_b,
                               mxu_dtype=mxu_dtype,
                               approx_recip=approx_recip)

    # Advisory cost estimate for XLA's scheduler.
    flops = 2 * B * (Nq * C * C                 # q proj
                     + Nkv * C * 2 * C          # kv proj
                     + num_heads * Nq * Nkv * head_dim * 2  # qk^T + pv
                     + Nq * C * C)              # out proj
    transcendentals = B * num_heads * Nq * Nkv  # exp in softmax
    w_itemsize = jnp.dtype(mxu_dtype).itemsize
    bytes_accessed = (4 * (x_q.size + x_kv.size + B * Nq * C + C)
                      + w_itemsize * (C * C + C * 2 * C + C * C))

    return pl.pallas_call(
        kernel,
        out_shape=jax.ShapeDtypeStruct((B, Nq, C), x_q.dtype),
        grid=(grid_b,),
        in_specs=[
            pl.BlockSpec((block_b, Nq, C), lambda b: (b, 0, 0)),
            pl.BlockSpec((block_b, Nkv, C), lambda b: (b, 0, 0)),
            pl.BlockSpec((C, C), lambda b: (0, 0)),
            pl.BlockSpec((C, 2 * C), lambda b: (0, 0)),
            pl.BlockSpec((C, C), lambda b: (0, 0)),
            pl.BlockSpec((1, C), lambda b: (0, 0)),
        ],
        out_specs=pl.BlockSpec((block_b, Nq, C), lambda b: (b, 0, 0)),
        compiler_params=pltpu.CompilerParams(
            dimension_semantics=("parallel",),
            vmem_limit_bytes=48 * 1024 * 1024),
        cost_estimate=pl.CostEstimate(flops=flops,
                                      transcendentals=transcendentals,
                                      bytes_accessed=bytes_accessed),
    )(x_q, x_kv, wq_t, wkv_t, wproj_t, bproj)


def cross_attention_ref(x_q, x_kv, params, *, num_heads):
    """Pure-JAX reference mirroring the PyTorch forward."""
    B, Nkv, C = x_kv.shape
    _, Nq, _ = x_q.shape
    head_dim = C // num_heads
    scale = head_dim ** (-0.5)

    kv = x_kv @ params['wkv'].T                       # (B, Nkv, 2C)
    kv = kv.reshape(B, Nkv, 2, num_heads, head_dim).transpose(2, 0, 3, 1, 4)
    k, v = kv[0], kv[1]                               # (B, H, Nkv, hd)
    q = (x_q @ params['wq'].T).reshape(B, Nq, 1, num_heads, head_dim)
    q = q.transpose(2, 0, 3, 1, 4)[0]                 # (B, H, Nq, hd)

    attn = (q @ k.transpose(0, 1, 3, 2)) * scale      # (B, H, Nq, Nkv)
    attn = jax.nn.softmax(attn, axis=-1)
    x = (attn @ v).transpose(0, 2, 1, 3).reshape(B, Nq, C)
    x = x @ params['wproj'].T + params['bproj']
    return x


def init_params(key, dim):
    """Deterministic synthetic params; PyTorch nn.Linear layout (out, in)."""
    k1, k2, k3, k4 = jax.random.split(key, 4)
    bound = 1.0 / (dim ** 0.5)
    return {
        'wq': jax.random.uniform(k1, (dim, dim), jnp.float32, -bound, bound),
        'wkv': jax.random.uniform(k2, (2 * dim, dim), jnp.float32, -bound, bound),
        'wproj': jax.random.uniform(k3, (dim, dim), jnp.float32, -bound, bound),
        'bproj': jax.random.uniform(k4, (dim,), jnp.float32, -bound, bound),
    }


if __name__ == "__main__":
    B, Nq, Nkv, C = 2, 8, 16, 32
    num_heads = 4  # head_dim = 8

    key = jax.random.PRNGKey(0)
    kq, kkv, kp = jax.random.split(key, 3)
    x_q = jax.random.normal(kq, (B, Nq, C), jnp.float32)
    x_kv = jax.random.normal(kkv, (B, Nkv, C), jnp.float32)
    params = init_params(kp, C)

    ref = cross_attention_ref(x_q, x_kv, params, num_heads=num_heads)

    # 1) Exact path (f32 MXU operands, exact reciprocal) -> tight check of the
    #    kernel structure against the reference.
    out_exact = cross_attention_pallas(x_q, x_kv, params, num_heads=num_heads,
                                       mxu_dtype=jnp.float32,
                                       approx_recip=False)
    out_exact = jax.block_until_ready(out_exact)
    assert out_exact.shape == (B, Nq, C)
    assert jnp.allclose(out_exact, ref, atol=1e-4, rtol=1e-4), \
        "exact-path mismatch vs reference"

    # 2) Fast path (default: bf16 MXU operands + approx reciprocal) -> looser
    #    tolerance for the bf16/approx drift.
    out_fast = cross_attention_pallas(x_q, x_kv, params, num_heads=num_heads)
    out_fast = jax.block_until_ready(out_fast)
    assert out_fast.shape == (B, Nq, C)
    assert jnp.allclose(out_fast, ref, atol=5e-2, rtol=5e-2), \
        "fast-path mismatch vs reference"

    print("KERNEL_OK")
</pallas_src>

<mosaic_0001>
module attributes {stable_mosaic.version = 11 : i64} {
  func.func @_cross_attention_kernel(%arg0: i32, %arg1: memref<1x8x32xf32, #tpu.memory_space<vmem>>, %arg2: memref<1x16x32xf32, #tpu.memory_space<vmem>>, %arg3: memref<32x32xf32, #tpu.memory_space<vmem>>, %arg4: memref<32x64xf32, #tpu.memory_space<vmem>>, %arg5: memref<32x32xf32, #tpu.memory_space<vmem>>, %arg6: memref<1x32xf32, #tpu.memory_space<vmem>>, %arg7: memref<1x8x32xf32, #tpu.memory_space<vmem>>) attributes {dimension_semantics = [#tpu.dimension_semantics<parallel>], iteration_bounds = array<i64: 2>, scalar_prefetch = 0 : i64, scratch_operands = 0 : i64, tpu.core_type = #tpu.core_type<tc>, window_params = [{transform_indices = @transform_0, window_bounds = array<i64: 1, 8, 32>}, {transform_indices = @transform_1, window_bounds = array<i64: 1, 16, 32>}, {pipeline_mode = #tpu.pipeline_mode<synchronous>, transform_indices = @transform_2, window_bounds = array<i64: 32, 32>}, {pipeline_mode = #tpu.pipeline_mode<synchronous>, transform_indices = @transform_3, window_bounds = array<i64: 32, 64>}, {pipeline_mode = #tpu.pipeline_mode<synchronous>, transform_indices = @transform_4, window_bounds = array<i64: 32, 32>}, {pipeline_mode = #tpu.pipeline_mode<synchronous>, transform_indices = @transform_5, window_bounds = array<i64: 1, 32>}, {transform_indices = @transform_6, window_bounds = array<i64: 1, 8, 32>}]} {
    %c0 = arith.constant 0 : index
    %c0_0 = arith.constant 0 : index
    %c0_1 = arith.constant 0 : index
    %0 = vector.load %arg1[%c0, %c0_0, %c0_1] : memref<1x8x32xf32, #tpu.memory_space<vmem>>, vector<1x8x32xf32>
    %1 = vector.shape_cast %0 : vector<1x8x32xf32> to vector<8x32xf32>
    %c0_2 = arith.constant 0 : index
    %c0_3 = arith.constant 0 : index
    %c0_4 = arith.constant 0 : index
    %2 = vector.load %arg2[%c0_2, %c0_3, %c0_4] : memref<1x16x32xf32, #tpu.memory_space<vmem>>, vector<1x16x32xf32>
    %3 = vector.shape_cast %2 : vector<1x16x32xf32> to vector<16x32xf32>
    %c0_5 = arith.constant 0 : index
    %c0_6 = arith.constant 0 : index
    %4 = vector.load %arg3[%c0_5, %c0_6] : memref<32x32xf32, #tpu.memory_space<vmem>>, vector<32x32xf32>
    %cst = arith.constant dense<0.000000e+00> : vector<8x32xf32>
    %5 = tpu.matmul %1, %4, %cst {dimension_numbers = #tpu.dot_dimension_numbers<[1], [0], [0], [1], [0, 0, 1, 1], [], []>} : vector<8x32xf32>, vector<32x32xf32>, vector<8x32xf32> -> vector<8x32xf32>
    %c0_7 = arith.constant 0 : index
    %c0_8 = arith.constant 0 : index
    %6 = vector.load %arg4[%c0_7, %c0_8] : memref<32x64xf32, #tpu.memory_space<vmem>>, vector<32x64xf32>
    %cst_9 = arith.constant dense<0.000000e+00> : vector<16x64xf32>
    %7 = tpu.matmul %3, %6, %cst_9 {dimension_numbers = #tpu.dot_dimension_numbers<[1], [0], [0], [1], [0, 0, 1, 1], [], []>} : vector<16x32xf32>, vector<32x64xf32>, vector<16x64xf32> -> vector<16x64xf32>
    %8 = vector.extract_strided_slice %7 {offsets = [0, 0], sizes = [16, 32], strides = [1, 1]} : vector<16x64xf32> to vector<16x32xf32>
    %9 = vector.extract_strided_slice %7 {offsets = [0, 32], sizes = [16, 32], strides = [1, 1]} : vector<16x64xf32> to vector<16x32xf32>
    %10 = vector.extract_strided_slice %5 {offsets = [0, 0], sizes = [8, 8], strides = [1, 1]} : vector<8x32xf32> to vector<8x8xf32>
    %11 = vector.extract_strided_slice %8 {offsets = [0, 0], sizes = [16, 8], strides = [1, 1]} : vector<16x32xf32> to vector<16x8xf32>
    %12 = vector.extract_strided_slice %9 {offsets = [0, 0], sizes = [16, 8], strides = [1, 1]} : vector<16x32xf32> to vector<16x8xf32>
    %cst_10 = arith.constant dense<0.000000e+00> : vector<8x16xf32>
    %13 = tpu.matmul %10, %11, %cst_10 {dimension_numbers = #tpu.dot_dimension_numbers<[1], [1], [0], [0], [0, 0, 1, 0], [], []>} : vector<8x8xf32>, vector<16x8xf32>, vector<8x16xf32> -> vector<8x16xf32>
    %cst_11 = arith.constant dense<0xFF800000> : vector<8xf32>
    %14 = vector.multi_reduction <maximumf>, %13, %cst_11 [1] : vector<8x16xf32> to vector<8xf32>
    %15 = vector.shape_cast %14 : vector<8xf32> to vector<8x1xf32>
    %16 = vector.broadcast %15 : vector<8x1xf32> to vector<8x16xf32>
    %17 = arith.subf %13, %16 : vector<8x16xf32>
    %18 = math.exp %17 : vector<8x16xf32>
    %cst_12 = arith.constant dense<0.000000e+00> : vector<8xf32>
    %19 = vector.multi_reduction <add>, %18, %cst_12 [1] : vector<8x16xf32> to vector<8xf32>
    %20 = vector.shape_cast %19 : vector<8xf32> to vector<8x1xf32>
    %21 = tpu.reciprocal %20 : vector<8x1xf32> -> vector<8x1xf32>
    %22 = vector.broadcast %21 : vector<8x1xf32> to vector<8x16xf32>
    %23 = arith.mulf %18, %22 : vector<8x16xf32>
    %cst_13 = arith.constant dense<0.000000e+00> : vector<8x8xf32>
    %24 = tpu.matmul %23, %12, %cst_13 {dimension_numbers = #tpu.dot_dimension_numbers<[1], [0], [0], [1], [0, 0, 1, 1], [], []>} : vector<8x16xf32>, vector<16x8xf32>, vector<8x8xf32> -> vector<8x8xf32>
    %25 = vector.extract_strided_slice %5 {offsets = [0, 8], sizes = [8, 8], strides = [1, 1]} : vector<8x32xf32> to vector<8x8xf32>
    %26 = vector.extract_strided_slice %8 {offsets = [0, 8], sizes = [16, 8], strides = [1, 1]} : vector<16x32xf32> to vector<16x8xf32>
    %27 = vector.extract_strided_slice %9 {offsets = [0, 8], sizes = [16, 8], strides = [1, 1]} : vector<16x32xf32> to vector<16x8xf32>
    %cst_14 = arith.constant dense<0.000000e+00> : vector<8x16xf32>
    %28 = tpu.matmul %25, %26, %cst_14 {dimension_numbers = #tpu.dot_dimension_numbers<[1], [1], [0], [0], [0, 0, 1, 0], [], []>} : vector<8x8xf32>, vector<16x8xf32>, vector<8x16xf32> -> vector<8x16xf32>
    %cst_15 = arith.constant dense<0xFF800000> : vector<8xf32>
    %29 = vector.multi_reduction <maximumf>, %28, %cst_15 [1] : vector<8x16xf32> to vector<8xf32>
    %30 = vector.shape_cast %29 : vector<8xf32> to vector<8x1xf32>
    %31 = vector.broadcast %30 : vector<8x1xf32> to vector<8x16xf32>
    %32 = arith.subf %28, %31 : vector<8x16xf32>
    %33 = math.exp %32 : vector<8x16xf32>
    %cst_16 = arith.constant dense<0.000000e+00> : vector<8xf32>
    %34 = vector.multi_reduction <add>, %33, %cst_16 [1] : vector<8x16xf32> to vector<8xf32>
    %35 = vector.shape_cast %34 : vector<8xf32> to vector<8x1xf32>
    %36 = tpu.reciprocal %35 : vector<8x1xf32> -> vector<8x1xf32>
    %37 = vector.broadcast %36 : vector<8x1xf32> to vector<8x16xf32>
    %38 = arith.mulf %33, %37 : vector<8x16xf32>
    %cst_17 = arith.constant dense<0.000000e+00> : vector<8x8xf32>
    %39 = tpu.matmul %38, %27, %cst_17 {dimension_numbers = #tpu.dot_dimension_numbers<[1], [0], [0], [1], [0, 0, 1, 1], [], []>} : vector<8x16xf32>, vector<16x8xf32>, vector<8x8xf32> -> vector<8x8xf32>
    %40 = vector.extract_strided_slice %5 {offsets = [0, 16], sizes = [8, 8], strides = [1, 1]} : vector<8x32xf32> to vector<8x8xf32>
    %41 = vector.extract_strided_slice %8 {offsets = [0, 16], sizes = [16, 8], strides = [1, 1]} : vector<16x32xf32> to vector<16x8xf32>
    %42 = vector.extract_strided_slice %9 {offsets = [0, 16], sizes = [16, 8], strides = [1, 1]} : vector<16x32xf32> to vector<16x8xf32>
    %cst_18 = arith.constant dense<0.000000e+00> : vector<8x16xf32>
    %43 = tpu.matmul %40, %41, %cst_18 {dimension_numbers = #tpu.dot_dimension_numbers<[1], [1], [0], [0], [0, 0, 1, 0], [], []>} : vector<8x8xf32>, vector<16x8xf32>, vector<8x16xf32> -> vector<8x16xf32>
    %cst_19 = arith.constant dense<0xFF800000> : vector<8xf32>
    %44 = vector.multi_reduction <maximumf>, %43, %cst_19 [1] : vector<8x16xf32> to vector<8xf32>
    %45 = vector.shape_cast %44 : vector<8xf32> to vector<8x1xf32>
    %46 = vector.broadcast %45 : vector<8x1xf32> to vector<8x16xf32>
    %47 = arith.subf %43, %46 : vector<8x16xf32>
    %48 = math.exp %47 : vector<8x16xf32>
    %cst_20 = arith.constant dense<0.000000e+00> : vector<8xf32>
    %49 = vector.multi_reduction <add>, %48, %cst_20 [1] : vector<8x16xf32> to vector<8xf32>
    %50 = vector.shape_cast %49 : vector<8xf32> to vector<8x1xf32>
    %51 = tpu.reciprocal %50 : vector<8x1xf32> -> vector<8x1xf32>
    %52 = vector.broadcast %51 : vector<8x1xf32> to vector<8x16xf32>
    %53 = arith.mulf %48, %52 : vector<8x16xf32>
    %cst_21 = arith.constant dense<0.000000e+00> : vector<8x8xf32>
    %54 = tpu.matmul %53, %42, %cst_21 {dimension_numbers = #tpu.dot_dimension_numbers<[1], [0], [0], [1], [0, 0, 1, 1], [], []>} : vector<8x16xf32>, vector<16x8xf32>, vector<8x8xf32> -> vector<8x8xf32>
    %55 = vector.extract_strided_slice %5 {offsets = [0, 24], sizes = [8, 8], strides = [1, 1]} : vector<8x32xf32> to vector<8x8xf32>
    %56 = vector.extract_strided_slice %8 {offsets = [0, 24], sizes = [16, 8], strides = [1, 1]} : vector<16x32xf32> to vector<16x8xf32>
    %57 = vector.extract_strided_slice %9 {offsets = [0, 24], sizes = [16, 8], strides = [1, 1]} : vector<16x32xf32> to vector<16x8xf32>
    %cst_22 = arith.constant dense<0.000000e+00> : vector<8x16xf32>
    %58 = tpu.matmul %55, %56, %cst_22 {dimension_numbers = #tpu.dot_dimension_numbers<[1], [1], [0], [0], [0, 0, 1, 0], [], []>} : vector<8x8xf32>, vector<16x8xf32>, vector<8x16xf32> -> vector<8x16xf32>
    %cst_23 = arith.constant dense<0xFF800000> : vector<8xf32>
    %59 = vector.multi_reduction <maximumf>, %58, %cst_23 [1] : vector<8x16xf32> to vector<8xf32>
    %60 = vector.shape_cast %59 : vector<8xf32> to vector<8x1xf32>
    %61 = vector.broadcast %60 : vector<8x1xf32> to vector<8x16xf32>
    %62 = arith.subf %58, %61 : vector<8x16xf32>
    %63 = math.exp %62 : vector<8x16xf32>
    %cst_24 = arith.constant dense<0.000000e+00> : vector<8xf32>
    %64 = vector.multi_reduction <add>, %63, %cst_24 [1] : vector<8x16xf32> to vector<8xf32>
    %65 = vector.shape_cast %64 : vector<8xf32> to vector<8x1xf32>
    %66 = tpu.reciprocal %65 : vector<8x1xf32> -> vector<8x1xf32>
    %67 = vector.broadcast %66 : vector<8x1xf32> to vector<8x16xf32>
    %68 = arith.mulf %63, %67 : vector<8x16xf32>
    %cst_25 = arith.constant dense<0.000000e+00> : vector<8x8xf32>
    %69 = tpu.matmul %68, %57, %cst_25 {dimension_numbers = #tpu.dot_dimension_numbers<[1], [0], [0], [1], [0, 0, 1, 1], [], []>} : vector<8x16xf32>, vector<16x8xf32>, vector<8x8xf32> -> vector<8x8xf32>
    %70 = tpu.concatenate %24, %39, %54, %69 in 1 : vector<8x8xf32>, vector<8x8xf32>, vector<8x8xf32>, vector<8x8xf32> -> vector<8x32xf32>
    %c0_26 = arith.constant 0 : index
    %c0_27 = arith.constant 0 : index
    %71 = vector.load %arg5[%c0_26, %c0_27] : memref<32x32xf32, #tpu.memory_space<vmem>>, vector<32x32xf32>
    %cst_28 = arith.constant dense<0.000000e+00> : vector<8x32xf32>
    %72 = tpu.matmul %70, %71, %cst_28 {dimension_numbers = #tpu.dot_dimension_numbers<[1], [0], [0], [1], [0, 0, 1, 1], [], []>} : vector<8x32xf32>, vector<32x32xf32>, vector<8x32xf32> -> vector<8x32xf32>
    %c0_29 = arith.constant 0 : index
    %c0_30 = arith.constant 0 : index
    %73 = vector.load %arg6[%c0_29, %c0_30] : memref<1x32xf32, #tpu.memory_space<vmem>>, vector<1x32xf32>
    %74 = vector.broadcast %73 : vector<1x32xf32> to vector<8x32xf32>
    %75 = arith.addf %72, %74 : vector<8x32xf32>
    %76 = vector.shape_cast %75 : vector<8x32xf32> to vector<1x8x32xf32>
    %c0_31 = arith.constant 0 : index
    %c0_32 = arith.constant 0 : index
    %c0_33 = arith.constant 0 : index
    %77 = vector.load %arg7[%c0_31, %c0_32, %c0_33] : memref<1x8x32xf32, #tpu.memory_space<vmem>>, vector<1x8x32xf32>
    tpu.vector_store %arg7[%c0_31, %c0_32, %c0_33], %76 {strides = array<i32>} : memref<1x8x32xf32, #tpu.memory_space<vmem>>, vector<1x8x32xf32>,
    return
  }
  func.func @transform_0(%arg0: i32) -> (i32, i32, i32) {
    %c0_i32 = arith.constant 0 : i32
    %c0_i32_0 = arith.constant 0 : i32
    %c0_i32_1 = arith.constant 0 : i32
    return %arg0, %c0_i32, %c0_i32_0 : i32, i32, i32
  }
  func.func @transform_1(%arg0: i32) -> (i32, i32, i32) {
    %c0_i32 = arith.constant 0 : i32
    %c0_i32_0 = arith.constant 0 : i32
    %c0_i32_1 = arith.constant 0 : i32
    return %arg0, %c0_i32, %c0_i32_0 : i32, i32, i32
  }
  func.func @transform_2(%arg0: i32) -> (i32, i32) {
    %c0_i32 = arith.constant 0 : i32
    %c0_i32_0 = arith.constant 0 : i32
    %c0_i32_1 = arith.constant 0 : i32
    return %c0_i32, %c0_i32_0 : i32, i32
  }
  func.func @transform_3(%arg0: i32) -> (i32, i32) {
    %c0_i32 = arith.constant 0 : i32
    %c0_i32_0 = arith.constant 0 : i32
    %c0_i32_1 = arith.constant 0 : i32
    return %c0_i32, %c0_i32_0 : i32, i32
  }
  func.func @transform_4(%arg0: i32) -> (i32, i32) {
    %c0_i32 = arith.constant 0 : i32
    %c0_i32_0 = arith.constant 0 : i32
    %c0_i32_1 = arith.constant 0 : i32
    return %c0_i32, %c0_i32_0 : i32, i32
  }
  func.func @transform_5(%arg0: i32) -> (i32, i32) {
    %c0_i32 = arith.constant 0 : i32
    %c0_i32_0 = arith.constant 0 : i32
    %c0_i32_1 = arith.constant 0 : i32
    return %c0_i32, %c0_i32_0 : i32, i32
  }
  func.func @transform_6(%arg0: i32) -> (i32, i32, i32) {
    %c0_i32 = arith.constant 0 : i32
    %c0_i32_0 = arith.constant 0 : i32
    %c0_i32_1 = arith.constant 0 : i32
    return %arg0, %c0_i32, %c0_i32_0 : i32, i32, i32
  }
}

</mosaic_0001>

<bundles_post_ra>
// kernel: tpu_custom_call.1
= control target key start
LH: loop header
LB: loop body
LE: loop exit
PB: predicated region body
PF: predicated region fallthrough
CT: control target
= control target key end

     0   :  { %s2353_s0 = inlined_call_operand.hbm [shape: f32[2,8,32], index: 0, kind: input, shape index: {}]   ;;  %s2354_s1 = inlined_call_operand.hbm [shape: f32[2,16,32], index: 1, kind: input, shape index: {}]   ;;  %s2355_s2 = inlined_call_operand.hbm [shape: f32[32,32], index: 2, kind: input, shape index: {}]   ;;  %s2356_s3 = inlined_call_operand.hbm [shape: f32[32,64], index: 3, kind: input, shape index: {}]   ;;  %s2357_s4 = inlined_call_operand.hbm [shape: f32[32,32], index: 4, kind: input, shape index: {}]   ;;  %s2358_s5 = inlined_call_operand.vmem [shape: f32[1,32], index: 5, kind: input, shape index: {}]   ;;  %s2359_s6 = inlined_call_operand.hbm [shape: f32[2,8,32], index: 6, kind: output, shape index: {}]  }
   0x1   :  { %2366 = sst [smem:[#allocation17_spill]] %s2355_s2 }
   0x2   :  { %11 = vsyncpa [#allocation3], 0 }
   0x3   :  { %13 = vsyncpa [#allocation3 + $0x1], 0 }
   0x4   :  { %14 = vsyncpa [#allocation6], 0 }
   0x5   :  { %16 = vsyncpa [#allocation6 + $0x1], 0 }
   0x6   :  { %17 = vsyncpa [#allocation9], 0 }
   0x7   :  { %18 = vsyncpa [#allocation4], 0 }
   0x8   :  { %20 = vsyncpa [#allocation4 + $0x1], 0  ;;  %s1991_s21 = smov 0   ;;  %s1993_s22 = smov 0  }
   0x9   :  { %s1995_s23 = smov 0   ;;  %s1997_s24 = smov 0  }
   0xa LB: > { %s2012_s25 = sadd.s32 4294967295, %s1934_s24   ;;  %s1439_s26 = sadd.s32 4294967294, %s1934_s24   ;;  %s1934_s24 = sphi %s1997_s24, %s2388_s24   ;;  %s1930_s23 = sphi %s1995_s23, %s2387_s23   ;;  %s1926_s22 = sphi %s1993_s22, %s2386_s22   ;;  %s1922_s21 = sphi %s1991_s21, %s2385_s21  }
   0xb   : > { %p46_p0 = scmp.ne.s32.totalorder %s1926_s22, %s1922_s21  ;;  %p2360_p1 = scmp.eq.s32.totalorder %s2012_s25, 0 }
   0xc   : > { %p180_p2 = scmp.eq.s32.totalorder %s2012_s25, 1  ;;  %p186_p3 = scmp.eq.s32.totalorder %s1439_s26, 1 }
   0xd   : > { %p2021_p4 = por %p2360_p1, %p46_p0  ;;  %p1440_p5 = scmp.ge.s32.totalorder %s1934_s24, 1 }
   0xe   : > { %p2026_p6 = por %p186_p3, %p46_p0  ;;  %p193_p7 = scmp.lt.s32.totalorder %s1934_s24, 3 }
   0xf   : > { %s2367_s27 = scalar_select %p2021_p4, 1, 0 }
  0x10   : > { %s2368_s28 = scalar_select %p2026_p6, 1, 0 }
  0x11   : > { %p2031_p8 = pnand %p1440_p5, %p193_p7  ;;  %s1936_s30 = smov [#allocation7]  }
  0x12   : > { %s205_s7 = sshll.u32 %s1936_s30, 4  ;;  %s1937_s9 = smov [#allocation8]   ;;  %s206_s7 = int_to_ptr.vmem [resolvable:$true] %s205_s7 }
  0x13   : > { %s2369_s29 = scalar_select %p2031_p8, 1, 0 }
  0x14   : > { %p1630_p9 = pneg %p2031_p8  ;;  %s218_s10 = sshll.u32 %s1937_s9, 4  ;;  %s219_s10 = int_to_ptr.vmem [resolvable:$true] %s218_s10 }
  0x15   : > { %s1938_s11 = smov [#allocation10]   ;;  %s1735_s13 = scalar_lea.vmem %s206_s7, 512 }
  0x16   : > { %p2040_p11 = pnand %p1630_p9, %p2360_p1  ;;  %s231_s12 = sshll.u32 %s1938_s11, 4  ;;  %s232_s12 = int_to_ptr.vmem [resolvable:$true] %s231_s12 }
  0x17   : > { %p1736_p13 = scmp.ne.s32.totalorder %s206_s7, %s1735_s13  ;;  %p1743_p5 = scmp.lt.s32.totalorder %s206_s7, %s206_s7 }
  0x18   : > { %p1726_p12 = pneg %p2040_p11  ;;  %p1744_p7 = scmp.lt.s32.totalorder %s1735_s13, %s1735_s13 }
  0x1a   : > { %p1738_p0 = pnand %p1736_p13, %p1726_p12  ;;  %p1745_p9 = por %p1744_p7, %p1743_p5 }
  0x1c   : > { %p1739_p3 = pneg %p1738_p0 }
  0x1e   : > { %p1746_p10 = pnand %p1745_p9, %p1739_p3 }
  0x20   : > { %1749 = shalt.err (!%p1746_p10)
}
  0x21   : > { %s2361_s14 = smov 128   ;;  %s2362_s15 = smov 8  }
  0x22   : > { %s2371_s2 = sld [smem:[#allocation17_spill]]  ;;  %s1761_s18 = scalar_lea.vmem %s219_s10, 512 }
  0x23   : > { %p1762_p13 = scmp.ne.s32.totalorder %s219_s10, %s1761_s18  ;;  %p1769_p3 = scmp.lt.s32.totalorder %s219_s10, %s219_s10 }
  0x24   : > { %p1770_p10 = scmp.lt.s32.totalorder %s1761_s18, %s1761_s18 }
  0x25   : > { %p1764_p0 = pnand %p1762_p13, %p1726_p12 }
  0x26   : > { %p1771_p7 = por %p1770_p10, %p1769_p3 }
  0x27   : > { %p1765_p5 = pneg %p1764_p0 }
  0x28   : > { %1633 = dma.hbm_to_vmem [thread:$0]  (!%p2040_p11), %s2371_s2, 512, %s206_s7, [#allocation6], %s2361_s14, %s2361_s14, %s2362_s15  }
  0x29   : > { %p1772_p9 = pnand %p1771_p7, %p1765_p5 }
  0x2b   : > { %1775 = shalt.err (!%p1772_p9)
}
  0x2c   : > { %1636 = dma.hbm_to_vmem [thread:$0]  (!%p2040_p11), %s2356_s3, 512, %s219_s10, [#allocation9], %s2361_s14, %s2361_s14, %s2362_s15  }
  0x2d   : > { %s1787_s26 = scalar_lea.vmem %s232_s12, 512  ;;  %p1795_p3 = scmp.lt.s32.totalorder %s232_s12, %s232_s12 }
  0x2e   : > { %p1788_p1 = scmp.ne.s32.totalorder %s232_s12, %s1787_s26  ;;  %p1796_p5 = scmp.lt.s32.totalorder %s1787_s26, %s1787_s26 }
  0x30   : > { %p1790_p13 = pnand %p1788_p1, %p1726_p12  ;;  %p1797_p10 = por %p1796_p5, %p1795_p3 }
  0x32   : > { %p1791_p0 = pneg %p1790_p13 }
  0x34   : > { %p1798_p7 = pnand %p1797_p10, %p1791_p0 }
  0x36   : > { %1801 = shalt.err (!%p1798_p7)
}
  0x37   : > { %1639 = dma.hbm_to_vmem [thread:$0]  (!%p2040_p11), %s2357_s4, 512, %s232_s12, [#allocation9], %s2361_s14, %s2361_s14, %s2362_s15  }
  0x38   : > { %s2080_s9 = sadd.s32 1, %s1934_s24   ;;  %s33_s10 = sadd.s32 1, %s1930_s23 }
  0x39   : > { %s30_s8 = ssub.s32 %s1934_s24, %s2080_s9  ;;  %p40_p12 = scmp.ne.s32.totalorder %s1930_s23, %s1926_s22 }
  0x3a   : > { %p31_p1 = scmp.eq.s32.totalorder %s30_s8, 0  ;;  %p41_p9 = scmp.eq.s32.totalorder %s1934_s24, 0 }
  0x3b   : > { %p1654_p13 = scmp.lt.s32.totalorder %s1934_s24, 2  ;;  %p2094_p3 = por %p180_p2, %p40_p12 }
  0x3c   : > { %s2090_s11 = scalar_select %p31_p1, %s1930_s23, %s33_s10  }
  0x3d   : > { %p42_p0 = por %p41_p9, %p40_p12  ;;  %s2099_s16 = sand.u32 1, %s1930_s23  }
  0x3e   : > { %s2372_s13 = scalar_select %p2094_p3, 1, 0 }
  0x3f   : > { %s1446_s12 = sshll.u32 %s1934_s24, 7  ;;  %s1445_s17 = sshll.u32 %s2099_s16, 3 }
  0x40   : > { %s2106_s20 = scalar_lea.hbm %s2353_s0, %s1446_s12  ;;  %s252_s26 = scalar_lea.vmem [#allocation2], %s1445_s17 }
  0x41   : > { %s259_s30 = sshll.u32 %s252_s26, 4  ;;  %p2108_p2 = pnand %p1654_p13, %p42_p0  ;;  %s260_s30 = int_to_ptr.vmem [resolvable:$true] %s259_s30 }
  0x42   : > { %s1447_s8 = sshll.u32 %s2099_s16, 4  ;;  %s249_s10 = scalar_lea.sflag [#allocation3], %s2099_s16 }
  0x43   : > { %s1802_s14 = scalar_lea.hbm %s2106_s20, 128  ;;  %p1804_p5 = pneg %p2108_p2 }
  0x44   : > { %p1803_p11 = scmp.ne.s32.totalorder %s2106_s20, %s1802_s14  ;;  %s1807_s18 = scalar_lea.hbm %s2353_s0, 256 }
  0x45   : > { %p1808_p1 = scmp.lt.s32.totalorder %s2106_s20, %s2353_s0  ;;  %p1809_p12 = scmp.lt.s32.totalorder %s1807_s18, %s1802_s14 }
  0x46   : > { %p1805_p10 = pnand %p1804_p5, %p1803_p11 }
  0x47   : > { %p1810_p9 = por %p1809_p12, %p1808_p1 }
  0x48   : > { %p1806_p7 = pneg %p1805_p10 }
  0x4a   : > { %p1811_p13 = pnand %p1810_p9, %p1806_p7 }
  0x4c   : > { %1814 = shalt.err (!%p1811_p13)
}
  0x4d   : > { %s1815_s16 = scalar_lea.vmem %s260_s30, 128  ;;  %s1941_s15 = smov [#allocation2]  }
  0x4e   : > { %p1816_p0 = scmp.ne.s32.totalorder %s260_s30, %s1815_s16  ;;  %s1820_s2 = sshll.u32 %s1941_s15, 4  ;;  %s1821_s2 = int_to_ptr.vmem [resolvable:$false] %s1820_s2 }
  0x4f   : > { %s1822_s12 = scalar_lea.vmem %s1821_s2, 256  ;;  %p1823_p10 = scmp.lt.s32.totalorder %s260_s30, %s1821_s2 }
  0x50   : > { %p1818_p6 = pnand %p1816_p0, %p1804_p5  ;;  %p1824_p3 = scmp.lt.s32.totalorder %s1822_s12, %s1815_s16 }
  0x52   : > { %p1819_p11 = pneg %p1818_p6  ;;  %p1825_p4 = por %p1824_p3, %p1823_p10 }
  0x54   : > { %p1826_p8 = pnand %p1825_p4, %p1819_p11 }
  0x56   : > { %1829 = shalt.err (!%p1826_p8)
}
  0x57   : > { %1643 = dma.hbm_to_vmem [thread:$0]  (!%p2108_p2), %s2106_s20, 128, %s260_s30, %s249_s10  }
  0x58   : > { %s270_s14 = scalar_lea.vmem [#allocation5], %s1447_s8  ;;  %s266_s18 = sand.u32 1, %s1934_s24  }
  0x59   : > { %s277_s17 = sshll.u32 %s270_s14, 4  ;;  %s1482_s15 = sshll.u32 %s1934_s24, 8  ;;  %s2135_s17 = int_to_ptr.vmem [resolvable:$true] %s277_s17 }
  0x5a   : > { %s2141_s2 = scalar_lea.hbm %s2354_s1, %s1482_s15  ;;  %s267_s16 = scalar_lea.sflag [#allocation6], %s266_s18 }
  0x5b   : > { %s1830_s12 = scalar_lea.hbm %s2141_s2, 256  ;;  %s1835_s8 = scalar_lea.hbm %s2354_s1, 512 }
  0x5c   : > { %p1831_p4 = scmp.ne.s32.totalorder %s2141_s2, %s1830_s12  ;;  %p1836_p3 = scmp.lt.s32.totalorder %s2141_s2, %s2354_s1 }
  0x5d   : > { %p1837_p7 = scmp.lt.s32.totalorder %s1835_s8, %s1830_s12 }
  0x5e   : > { %p1833_p6 = pnand %p1831_p4, %p1804_p5 }
  0x5f   : > { %p1838_p1 = por %p1837_p7, %p1836_p3 }
  0x60   : > { %p1834_p8 = pneg %p1833_p6 }
  0x62   : > { %p1839_p12 = pnand %p1838_p1, %p1834_p8 }
  0x64   : > { %1842 = shalt.err (!%p1839_p12)
}
  0x65   : > { %s1843_s18 = scalar_lea.vmem %s2135_s17, 256  ;;  %s1942_s15 = smov [#allocation5]  }
  0x66   : > { %p1844_p9 = scmp.ne.s32.totalorder %s2135_s17, %s1843_s18  ;;  %s1848_s19 = sshll.u32 %s1942_s15, 4  ;;  %s1849_s19 = int_to_ptr.vmem [resolvable:$false] %s1848_s19 }
  0x67   : > { %s1850_s26 = scalar_lea.vmem %s1849_s19, 512  ;;  %p1851_p11 = scmp.lt.s32.totalorder %s2135_s17, %s1849_s19 }
  0x68   : > { %p1846_p13 = pnand %p1844_p9, %p1804_p5  ;;  %p1852_p10 = scmp.lt.s32.totalorder %s1850_s26, %s1843_s18 }
  0x6a   : > { %p1847_p0 = pneg %p1846_p13  ;;  %p1853_p4 = por %p1852_p10, %p1851_p11 }
  0x6c   : > { %p1854_p6 = pnand %p1853_p4, %p1847_p0 }
  0x6e   : > { %1857 = shalt.err (!%p1854_p6)
}
  0x6f   : > { %s2374_s12 = smov 8   ;;  %s2375_s20 = smov 128  }
  0x70   : > { %1646 = dma.hbm_to_vmem [thread:$0]  (!%p2108_p2), %s2141_s2, 256, %s2135_s17, %s267_s16, %s2375_s20, %s2375_s20, %s2374_s12  }
  0x71   : > { %p2376_p5 = scmp.ne.s32.totalorder %s2369_s29, 0 }
  0x72   : > { %s2171_s30 = sand.u32 (!%p2376_p5), 1, %s1926_s22   ;;  %p2377_p8 = scmp.ne.s32.totalorder (!%p2376_p5), %s2367_s27, 0 }
  0x73   : > { %289 = sbr.rel (%p2376_p5) target bundleno = 2392 (0x958), region = 44  ;;  %s1451_s8 = sshll.u32 (!%p2376_p5), %s2171_s30, 3 }
  0x74   : > { %s292_s10 = scalar_lea.sflag (!%p2376_p5), [#allocation3], %s2171_s30  ;;  %s2177_s7 = scalar_lea.vmem (!%p2376_p5), [#allocation2], %s1451_s8 }
  0x78   : > { %1901 = dma.done.wait (%p2377_p8), %s292_s10, 128  }
  0x79   : > { %1903 = vsyncadd (%p2377_p8), %s292_s10, 4294967168  ;;  %s300_s29 = sand.u32 1, %s2012_s25   ;;  %s1452_s17 = sshll.u32 %s2171_s30, 4 }
  0x7a   : > { %s301_s2 = scalar_lea.sflag [#allocation6], %s300_s29  ;;  %s304_s16 = scalar_lea.vmem [#allocation5], %s1452_s17 }
  0x7b   : > { %1905 = dma.done.wait (%p2377_p8), %s301_s2, 256  }
  0x7c   : > { %1907 = vsyncadd (%p2377_p8), %s301_s2, 4294967040  ;;  %p2378_p2 = scmp.eq.s32.totalorder %s2012_s25, 0 }
  0x7e   : > { %1909 = dma.done.wait (%p2378_p2), [#allocation6], 512   ;;  %p2379_p3 = pmov %p2378_p2 }
  0x7f   : > { %p2380_p7 = pmov %p2378_p2 }
  0x80   : > { %1911 = vsyncadd (%p2379_p3), [#allocation6], 4294966784 }
  0x81   : > { %1913 = dma.done.wait (%p2380_p7), [#allocation9], 1024   ;;  %p2381_p1 = pmov %p2378_p2 }
  0x82   : > { %v1943_v0 = vmov 0.0   ;;  %vm1944_vm0 = vmmov 0   ;;  %v434_v1 = vld [vmem:[#allocation8 + $0x18] sm:$0xff]  ;;  %v433_v2 = vld [vmem:[#allocation8 + $0x10] sm:$0xff]  ;;  %vm357_vm1 = vcmask 261120   ;;  %v432_v5 = vld [vmem:[#allocation8 + $0x8] sm:$0xff] }
  0x83   : > { %1915 = vsyncadd (%p2381_p1), [#allocation9], 4294966272  ;;  %1523 = vmatprep.subr.mxu0 %v1943_v0  ;;  %1531 = vmatprep.mubr.msk.f32.mxu0 %vm1944_vm0, %v1943_v0  ;;  %v356_v3 = vld [vmem:[#allocation7 + $0x18] sm:$0xff]  ;;  %v351_v4 = vld [vmem:[%s304_s16] sm:$0xff]  ;;  %vm516_vm2 = vcmask 64512   ;;  %s1945_s27 = smov 96  }
  0x84   : > { %1534 = vmatprep.subr.mxu1 %v434_v1  ;;  %1524 = vmatpush3.msra.mxu0 %v356_v3  ;;  %v355_v6 = vld [vmem:[#allocation7 + $0x10] sm:$0xff]  ;;  %v431_v7 = vld [vmem:[#allocation8] sm:$0xff]  ;;  %v354_v8 = vld [vmem:[#allocation7 + $0x8] sm:$0xff]  ;;  %s1946_s14 = smov 120   ;;  %s1947_s18 = smov 112   ;;  %vm596_vm3 = vcmask 130048  }
  0x85   : > { %1535 = vmatpush3.msra.mxu1 %v434_v1  ;;  %1525 = vmatprep.subr.mxu0 %v1943_v0  ;;  %v352_v9 = vld [vmem:[%s304_s16 + $0x8] sm:$0xff]  ;;  %v353_v10 = vld [vmem:[#allocation7] sm:$0xff]  ;;  %s1948_s15 = smov 88   ;;  %s1949_s19 = smov 80   ;;  %vm1217_vm4 = vcmask 195584  }
  0x86   : > { %1536 = vmatprep.subr.mxu1 %v433_v2  ;;  %1542 = vmatprep.mubr.msk.f32.mxu1 %vm357_vm1, %v351_v4  ;;  %v350_v11 = vld [vmem:[%s2177_s7] sm:$0xff]  ;;  %s1950_s26 = smov 104   ;;  %s1951_s12 = smov 72  }
  0x87   : > { %1537 = vmatpush3.msra.mxu1 %v433_v2  ;;  %1526 = vmatpush3.msra.mxu0 %v355_v6  ;;  %s1952_s20 = smov 8   ;;  %s1953_s10 = smov 16  }
  0x88   : > { %1538 = vmatprep.subr.mxu1 %v432_v5  ;;  %1527 = vmatprep.subr.mxu0 %v1943_v0  ;;  %s1954_s7 = smov 24   ;;  %s1479_s2 = sshll.u32 %s2012_s25, 7 }
  0x89   : > { %1539 = vmatpush3.msra.mxu1 %v432_v5  ;;  %1528 = vmatpush3.msra.mxu0 %v354_v8  ;;  %s349_s16 = scalar_lea.vmem [#allocation11], %s1451_s8  ;;  %p2382_p9 = scmp.ne.s32.totalorder %s2372_s13, 0 }
  0x8a   : > { %1540 = vmatprep.subr.mxu1 %v431_v7  ;;  %1529 = vmatprep.subr.mxu0 %v1943_v0  ;;  %s1955_s25 = smov [#allocation11]  }
  0x8b   : > { %1541 = vmatpush3.msra.mxu1 %v431_v7  ;;  %1530 = vmatpush3.msra.mxu0 %v353_v10  ;;  %s1862_s8 = sshll.u32 %s1955_s25, 4  ;;  %s1863_s8 = int_to_ptr.vmem [resolvable:$false] %s1862_s8 }
  0x8c   : > { %1543 = vmatmul.mubr.msk.f32.vlgmr.msra.gmra.mxu1 %vm357_vm1, %v352_v9  ;;  %1532 = vmatmul.mubr.msk.f32.vlgmr.msra.gmra.mxu0 %vm357_vm1, %v350_v11 }
  0x8d   : > { %1545 = vmatprep.subr.mxu0 %v1943_v0  ;;  %1549 = vmatprep.mubr.msk.f32.mxu0 %vm1944_vm0, %v1943_v0 }
  0x8e   : > { %1552 = vmatprep.subr.mxu1 %v1943_v0  ;;  %1556 = vmatprep.mubr.msk.f32.mxu1 %vm1944_vm0, %v1943_v0 }
 0x14c   : > { %v2213_v12 = vpop.f32.mrf.mxu1  ;;  %v2218_v13 = vpop.f32.mrf.mxu0 }
 0x14d   : > { %610 = vrot.lane.b32.xlu1 %v2213_v12, %s1945_s27  ;;  %1546 = vmatpush3.xpose.msk.msra.mxu0 %vm516_vm2, %v2213_v12 }
 0x14e   : > { %1547 = vmatprep.subr.mxu0 %v1943_v0  ;;  %v1533_v14 = vpop.f32.mrf.mxu0  ;;  %v2221_v15 = vpop.f32.mrf.mxu1 }
 0x151   : > { %608 = vrot.lane.b32.xlu1 %v2221_v15, %s1945_s27  ;;  %1548 = vmatpush3.xpose.msk.msra.mxu0 %vm516_vm2, %v2221_v15  ;;  %s1318_s27 = sshll.u32 %s349_s16, 4  ;;  %s1319_s27 = int_to_ptr.vmem [resolvable:$true] %s1318_s27 }
 0x152   : > { %1573 = vmatprep.subr.mxu0 %v1943_v0  ;;  %p1865_p11 = scmp.lt.s32.totalorder %s1319_s27, %s1863_s8 }
 0x154   : > { %1550 = vmatmul.mubr.msk.f32.vlgmr.msra.gmra.mxu0 %vm516_vm2, %v2218_v13 }
 0x155   : > { %689 = vrot.lane.b32.xlu1 %v2221_v15, %s1946_s14  ;;  %1577 = vmatprep.mubr.msk.f32.mxu0 %vm1944_vm0, %v1943_v0 }
 0x159   : > { %863 = vrot.lane.b32.xlu1 %v2213_v12, %s1947_s18 }
 0x15d   : > { %687 = vrot.lane.b32.xlu1 %v2218_v13, %s1946_s14 }
 0x161   : > { %861 = vrot.lane.b32.xlu1 %v2221_v15, %s1947_s18 }
 0x165   : > { %859 = vrot.lane.b32.xlu1 %v2218_v13, %s1947_s18 }
 0x1bf   : > { %v611_v16 = vpop.permute.xlu1 %610 }
 0x1c0   : > { %1553 = vmatpush3.msra.mxu1 %v611_v16 }
 0x1c1   : > { %1554 = vmatprep.subr.mxu1 %v1943_v0 }
 0x1c3   : > { %v609_v17 = vpop.permute.xlu1 %608 }
 0x1c4   : > { %1555 = vmatpush3.msra.mxu1 %v609_v17 }
 0x1c5   : > { %1559 = vmatprep.subr.mxu1 %v1943_v0 }
 0x1c7   : > { %v690_v18 = vpop.permute.xlu1 %689 }
 0x1cb   : > { %v864_v19 = vpop.permute.xlu1 %863 }
 0x1cc   : > { %1574 = vmatpush3.xpose.msk.msra.mxu0 %vm516_vm2, %v864_v19 }
 0x1cd   : > { %1575 = vmatprep.subr.mxu0 %v1943_v0 }
 0x1cf   : > { %v688_v20 = vpop.permute.xlu1 %687 }
 0x1d3   : > { %v862_v21 = vpop.permute.xlu1 %861 }
 0x1d4   : > { %1576 = vmatpush3.xpose.msk.msra.mxu0 %vm516_vm2, %v862_v21  ;;  %v1222_v21 = vld [vmem:[#allocation10 + $0x18] sm:$0xff] }
 0x1d5   : > { %1594 = vmatprep.subr.mxu0 %v1943_v0 }
 0x1d7   : > { %v860_v22 = vpop.permute.xlu1 %859 }
 0x1d8   : > { %1578 = vmatmul.mubr.msk.f32.vlgmr.msra.gmra.mxu0 %vm516_vm2, %v860_v22  ;;  %v1221_v22 = vld [vmem:[#allocation10 + $0x10] sm:$0xff] }
 0x1d9   : > { %1598 = vmatprep.mubr.msk.f32.mxu0 %vm1944_vm0, %v1943_v0 }
 0x214   : > { %v592_v23 = vpop.f32.mrf.mxu0 }
 0x215   : > { %v597_v24 = vsel %vm596_vm3, %v592_v23, -inf }
 0x216   : > { %598 = vmax.xlane.f32.xlu0 %v597_v24  ;;  %v1551_v25 = vpop.f32.mrf.mxu0 }
 0x298   : > { %v937_v26 = vpop.f32.mrf.mxu0 }
 0x299   : > { %v941_v33 = vsel %vm596_vm3, %v937_v26, -inf }
 0x29a   : > { %v1579_v27 = vpop.f32.mrf.mxu0 }
 0x29f   : > { %v599_v28 = vpop.xlane.xlu0 %598 }
 0x2a0   : > { %v600_v29 = vsub.f32 %v592_v23, %v599_v28  ;;  %v1219_v23 = vld [vmem:[#allocation10] sm:$0xff] }
 0x2a2   : > { %v601_v30 = vmul.f32 1.442695, %v600_v29 }
 0x2a4   : > { %1708 = vpow2.f32 %v601_v30 }
 0x2b1   : > { %v1709_v31 = vpop.eup %1708 }
 0x2b2   : > { %v603_v32 = vsel %vm596_vm3, %v1709_v31, 0.0 }
 0x2b3   : > { %604 = vadd.xlane.f32.xlu0 %v603_v32 }
 0x2c9   : > { %691 = vrot.lane.b32.xlu0 %v2213_v12, %s1946_s14 }
 0x2e8   : > { %942 = vmax.xlane.f32.xlu0 %v941_v33 }
 0x2fe   : > { %782 = vrot.lane.b32.xlu0 %v2213_v12, %s1948_s15 }
 0x33c   : > { %v605_v34 = vpop.xlane.xlu0 %604 }
 0x33d   : > { %1710 = vrcp.f32 %v605_v34 }
 0x340   : > { %v692_v37 = vpop.permute.xlu0 %691 }
 0x34a   : > { %v1711_v35 = vpop.eup %1710 }
 0x34b   : > { %v607_v36 = vmul.f32 %v1711_v35, %v1709_v31  ;;  %v1476_v31 = vld [vmem:[%s2358_s5] ss:$0 sm:$0xff] }
 0x34d   : > { %1557 = vmatmul.mubr.msk.f32.vlgmr.msra.gmra.mxu1 %vm596_vm3, %v607_v36 }
 0x34e   : > { %1560 = vmatpush3.xpose.msk.msra.mxu1 %vm516_vm2, %v692_v37  ;;  %1563 = vmatprep.mubr.msk.f32.mxu1 %vm1944_vm0, %v1943_v0 }
 0x34f   : > { %1561 = vmatprep.subr.mxu1 %v1943_v0 }
 0x352   : > { %1562 = vmatpush3.xpose.msk.msra.mxu1 %vm516_vm2, %v690_v18 }
 0x353   : > { %1566 = vmatprep.subr.mxu1 %v1943_v0 }
 0x355   : > { %1564 = vmatmul.mubr.msk.f32.vlgmr.msra.gmra.mxu1 %vm516_vm2, %v688_v20 }
 0x356   : > { %1570 = vmatprep.mubr.msk.f32.mxu1 %vm1944_vm0, %v1943_v0 }
 0x371   : > { %v943_v38 = vpop.xlane.xlu0 %942 }
 0x372   : > { %v944_v40 = vsub.f32 %v937_v26, %v943_v38 }
 0x374   : > { %v945_v41 = vmul.f32 1.442695, %v944_v40 }
 0x375   : > { %v783_v39 = vpop.permute.xlu0 %782 }
 0x376   : > { %1567 = vmatpush3.msra.mxu1 %v783_v39  ;;  %1712 = vpow2.f32 %v945_v41 }
 0x377   : > { %1568 = vmatprep.subr.mxu1 %v1943_v0 }
 0x383   : > { %v1713_v46 = vpop.eup %1712 }
 0x384   : > { %v947_v48 = vsel %vm596_vm3, %v1713_v46, 0.0 }
 0x40d   : > { %v2265_v42 = vpop.f32.mrf.mxu1 }
 0x40f   : > { %v1558_v43 = vpop.f32.mrf.mxu1 }
 0x415   : > { %v765_v44 = vpop.f32.mrf.mxu1 }
 0x416   : > { %v769_v45 = vsel %vm596_vm3, %v765_v44, -inf }
 0x417   : > { %770 = vmax.xlane.f32.xlu1 %v769_v45  ;;  %v1565_v47 = vpop.f32.mrf.mxu1 }
 0x41b   : > { %948 = vadd.xlane.f32.xlu1 %v947_v48 }
 0x42c   : > { %780 = vrot.lane.b32.xlu1 %v2221_v15, %s1948_s15  ;;  %s2315_s15 = scalar_lea.hbm %s2359_s6, %s1479_s2 }
 0x430   : > { %954 = vrot.lane.b32.xlu1 %v2213_v12, %s1949_s19 }
 0x434   : > { %1035 = vrot.lane.b32.xlu1 %v2213_v12, %s1950_s26 }
 0x438   : > { %1031 = vrot.lane.b32.xlu1 %v2218_v13, %s1950_s26 }
 0x4a0   : > { %v771_v49 = vpop.xlane.xlu1 %770 }
 0x4a1   : > { %v772_v50 = vsub.f32 %v765_v44, %v771_v49 }
 0x4a3   : > { %v773_v51 = vmul.f32 1.442695, %v772_v50 }
 0x4a4   : > { %v949_v52 = vpop.xlane.xlu1 %948 }
 0x4a5   : > { %1714 = vpow2.f32 %v773_v51 }
 0x4a8   : > { %v781_v53 = vpop.permute.xlu1 %780 }
 0x4a9   : > { %1569 = vmatpush3.msra.mxu1 %v781_v53 }
 0x4aa   : > { %1580 = vmatprep.subr.mxu1 %v1943_v0 }
 0x4ac   : > { %v955_v58 = vpop.permute.xlu1 %954 }
 0x4b0   : > { %v1036_v63 = vpop.permute.xlu1 %1035 }
 0x4b2   : > { %v1715_v54 = vpop.eup %1714 }
 0x4b3   : > { %v775_v55 = vsel %vm596_vm3, %v1715_v54, 0.0 }
 0x4b4   : > { %776 = vadd.xlane.f32.xlu0 %v775_v55  ;;  %v1032_v2 = vpop.permute.xlu1 %1031 }
 0x4ca   : > { %952 = vrot.lane.b32.xlu0 %v2221_v15, %s1949_s19  ;;  %s1305_s19 = scalar_lea.sflag [#allocation4], %s2171_s30 }
 0x4ce   : > { %1033 = vrot.lane.b32.xlu0 %v2221_v15, %s1950_s26  ;;  %s1858_s26 = scalar_lea.vmem %s1319_s27, 128 }
 0x4cf   : > { %p1859_p12 = scmp.ne.s32.totalorder %s1319_s27, %s1858_s26 }
 0x4d1   : > { %p1860_p13 = pnand %p1859_p12, %p2382_p9 }
 0x4d3   : > { %p1861_p0 = pneg %p1860_p13 }
 0x53d   : > { %v777_v56 = vpop.xlane.xlu0 %776 }
 0x53e   : > { %1716 = vrcp.f32 %v777_v56 }
 0x53f   : > { %1718 = vrcp.f32 %v949_v52 }
 0x541   : > { %v953_v61 = vpop.permute.xlu0 %952 }
 0x545   : > { %v1034_v1 = vpop.permute.xlu0 %1033 }
 0x54b   : > { %v1717_v57 = vpop.eup %1716 }
 0x54c   : > { %v779_v59 = vmul.f32 %v1717_v57, %v1715_v54  ;;  %v1719_v60 = vpop.eup %1718 }
 0x54d   : > { %v951_v62 = vmul.f32 %v1719_v60, %v1713_v46 }
 0x54e   : > { %1571 = vmatmul.mubr.msk.f32.vlgmr.msra.gmra.mxu1 %vm596_vm3, %v779_v59 }
 0x54f   : > { %1581 = vmatpush3.msra.mxu1 %v955_v58  ;;  %1584 = vmatprep.mubr.msk.f32.mxu1 %vm1944_vm0, %v1943_v0 }
 0x550   : > { %1582 = vmatprep.subr.mxu1 %v1943_v0 }
 0x551   : > { %1583 = vmatpush3.msra.mxu1 %v953_v61 }
 0x552   : > { %1587 = vmatprep.subr.mxu1 %v1943_v0  ;;  %1585 = vmatmul.mubr.msk.f32.vlgmr.msra.gmra.mxu1 %vm596_vm3, %v951_v62 }
 0x553   : > { %1588 = vmatpush3.xpose.msk.msra.mxu1 %vm516_vm2, %v1036_v63  ;;  %1591 = vmatprep.mubr.msk.f32.mxu1 %vm1944_vm0, %v1943_v0 }
 0x554   : > { %1589 = vmatprep.subr.mxu1 %v1943_v0 }
 0x557   : > { %1590 = vmatpush3.xpose.msk.msra.mxu1 %vm516_vm2, %v1034_v1 }
 0x55a   : > { %1592 = vmatmul.mubr.msk.f32.vlgmr.msra.gmra.mxu1 %vm516_vm2, %v1032_v2 }
 0x60e   : > { %v855_v3 = vpop.f32.mrf.mxu1 }
 0x610   : > { %v1572_v4 = vpop.f32.mrf.mxu1 }
 0x612   : > { %v1027_v5 = vpop.f32.mrf.mxu1 }
 0x614   : > { %v1586_v6 = vpop.f32.mrf.mxu1 }
 0x61a   : > { %v1109_v7 = vpop.f32.mrf.mxu1 }
 0x61b   : > { %v1113_v8 = vsel %vm596_vm3, %v1109_v7, -inf }
 0x61c   : > { %1114 = vmax.xlane.f32.xlu0 %v1113_v8  ;;  %v1593_v9 = vpop.f32.mrf.mxu1 }
 0x632   : > { %1126 = vrot.lane.b32.xlu0 %v2213_v12, %s1951_s12 }
 0x636   : > { %1204 = vrot.lane.b32.xlu0 %v855_v3, %s1952_s20 }
 0x6a5   : > { %v1115_v10 = vpop.xlane.xlu0 %1114 }
 0x6a6   : > { %v1116_v11 = vsub.f32 %v1109_v7, %v1115_v10 }
 0x6a8   : > { %v1117_v13 = vmul.f32 1.442695, %v1116_v11 }
 0x6a9   : > { %v1127_v14 = vpop.permute.xlu0 %1126 }
 0x6aa   : > { %1720 = vpow2.f32 %v1117_v13  ;;  %1595 = vmatpush3.msra.mxu0 %v1127_v14 }
 0x6ab   : > { %1596 = vmatprep.subr.mxu0 %v1943_v0 }
 0x6ad   : > { %v1205_v26 = vpop.permute.xlu0 %1204 }
 0x6ae   : > { %v1215_v28 = vsel %vm516_vm2, %v2265_v42, %v1205_v26 }
 0x6b7   : > { %v1721_v16 = vpop.eup %1720 }
 0x6b8   : > { %v1119_v17 = vsel %vm596_vm3, %v1721_v16, 0.0 }
 0x6b9   : > { %1120 = vadd.xlane.f32.xlu1 %v1119_v17 }
 0x6ca   : > { %1124 = vrot.lane.b32.xlu1 %v2221_v15, %s1951_s12  ;;  %v1220_v15 = vld [vmem:[#allocation10 + $0x8] sm:$0xff]  ;;  %s1864_s12 = scalar_lea.vmem %s1863_s8, 256 }
 0x6cb   : > { %p1866_p10 = scmp.lt.s32.totalorder %s1864_s12, %s1858_s26 }
 0x6cd   : > { %p1867_p4 = por %p1866_p10, %p1865_p11 }
 0x6ce   : > { %1208 = vrot.lane.b32.xlu1 %v1027_v5, %s1953_s10 }
 0x6cf   : > { %p1868_p6 = pnand %p1867_p4, %p1861_p0 }
 0x742   : > { %v1121_v18 = vpop.xlane.xlu1 %1120 }
 0x743   : > { %1722 = vrcp.f32 %v1121_v18 }
 0x746   : > { %v1125_v12 = vpop.permute.xlu1 %1124 }
 0x747   : > { %1597 = vmatpush3.msra.mxu0 %v1125_v12 }
 0x748   : > { %1601 = vmatprep.subr.mxu0 %v1943_v0 }
 0x74a   : > { %v1209_v27 = vpop.permute.xlu1 %1208 }
 0x74b   : > { %v1216_v29 = vsel %vm596_vm3, %v1215_v28, %v1209_v27 }
 0x750   : > { %v1723_v19 = vpop.eup %1722 }
 0x751   : > { %v1123_v20 = vmul.f32 %v1723_v19, %v1721_v16 }
 0x753   : > { %1599 = vmatmul.mubr.msk.f32.vlgmr.msra.gmra.mxu0 %vm596_vm3, %v1123_v20 }
 0x754   : > { %1609 = vmatprep.mubr.msk.f32.mxu0 %vm1944_vm0, %v1943_v0  ;;  %1602 = vmatpush3.msra.mxu0 %v1222_v21 }
 0x755   : > { %1603 = vmatprep.subr.mxu0 %v1943_v0 }
 0x756   : > { %1604 = vmatpush3.msra.mxu0 %v1221_v22 }
 0x757   : > { %1605 = vmatprep.subr.mxu0 %v1943_v0 }
 0x758   : > { %1606 = vmatpush3.msra.mxu0 %v1220_v15 }
 0x759   : > { %1607 = vmatprep.subr.mxu0 %v1943_v0 }
 0x75a   : > { %1608 = vmatpush3.msra.mxu0 %v1219_v23 }
 0x813   : > { %v1199_v24 = vpop.f32.mrf.mxu0 }
 0x814   : > { %1212 = vrot.lane.b32.xlu0 %v1199_v24, %s1954_s7 }
 0x815   : > { %v1600_v25 = vpop.f32.mrf.mxu0 }
 0x886   : > { %v1213_v30 = vpop.permute.xlu0 %1212 }
 0x887   : > { %v1218_v0 = vsel %vm1217_vm4, %v1216_v29, %v1213_v30 }
 0x888   : > { %1610 = vmatmul.mubr.msk.f32.vlgmr.msra.gmra.mxu0 %vm357_vm1, %v1218_v0 }
 0x948   : > { %v1299_v32 = vpop.f32.mrf.mxu0 }
 0x949   : > { %v1300_v33 = vadd.f32 %v1476_v31, %v1299_v32 }
 0x94a   : > { %v1611_v34 = vpop.f32.mrf.mxu0 }
 0x94b   : > { %1303 = vst.msk [vmem:[%s349_s16] sm:$0xff] %vm357_vm1, %v1300_v33 }
 0x94c   : > { %1871 = shalt.err (!%p1868_p6)
}
 0x94d   : > { %s1872_s20 = scalar_lea.hbm %s2315_s15, 128  ;;  %s1876_s7 = scalar_lea.hbm %s2359_s6, 256 }
 0x94e   : > { %p1873_p5 = scmp.ne.s32.totalorder %s2315_s15, %s1872_s20  ;;  %p1877_p3 = scmp.lt.s32.totalorder %s2315_s15, %s2359_s6 }
 0x94f   : > { %p1878_p7 = scmp.lt.s32.totalorder %s1876_s7, %s1872_s20 }
 0x950   : > { %p1874_p8 = pnand %p1873_p5, %p2382_p9 }
 0x951   : > { %p1879_p1 = por %p1878_p7, %p1877_p3 }
 0x952   : > { %p1875_p2 = pneg %p1874_p8 }
 0x954   : > { %p1880_p12 = pnand %p1879_p1, %p1875_p2 }
 0x956   : > { %1883 = shalt.err (!%p1880_p12)
}
 0x957   : > { %1628 = dma.vmem_to_hbm [thread:$0]  (%p2382_p9), %s1319_s27, 128, %s2315_s15, %s1305_s19  }
 0x958 PF: > { %s1330_s2 = sand.u32 1, %s1922_s21   ;;  %p2383_p13 = scmp.ne.s32.totalorder %s2368_s28, 0 }
 0x959   : > { %p2384_p0 = scmp.ge.s32.totalorder %s1934_s24, 2  ;;  %s1331_s16 = scalar_lea.sflag [#allocation4], %s1330_s2 }
 0x95b   : > { %p1648_p11 = pnand %p2384_p0, %p2383_p13 }
 0x95d   : > { %p1649_p10 = pneg %p1648_p11 }
 0x95f   : > { %1917 = dma.done.wait (%p1649_p10), %s1331_s16, 128  }
 0x960   : > { %1919 = vsyncadd (%p1649_p10), %s1331_s16, 4294967168  ;;  %p23_p4 = scmp.ge.s32.totalorder %s2080_s9, 4   ;;  %s2385_s21 = smov %s1926_s22 }
 0x961   : > { %s2386_s22 = smov %s1930_s23  ;;  %s2387_s23 = smov %s2090_s11 }
 0x962   : > { %s2388_s24 = smov %s2080_s9  ;;  %25 = sbr.rel (!%p23_p4) target bundleno = 10 (0xa), region = 114 }
 0x967   :  { %1336 = vsyncpa [#allocation3], 1 }
 0x968   :  { %1338 = vsyncpa [#allocation3 + $0x1], 1 }
 0x969   :  { %1339 = vsyncpa [#allocation6], 1 }
 0x96a   :  { %1341 = vsyncpa [#allocation6 + $0x1], 1 }
 0x96b   :  { %1342 = vsyncpa [#allocation9], 1 }
 0x96c   :  { %1343 = vsyncpa [#allocation4], 1 }
 0x96d   :  { %1345 = vsyncpa [#allocation4 + $0x1], 1 }

</bundles_post_ra>
